<compile_context>
chip_gen: v7x
topology: tpu7x:2x2x1
jax: 0.10.0
libtpu: 0.0.40
codegen_flags: <defaults>
</compile_context>

<pallas_src>
import numpy as np

import jax
import jax.numpy as jnp
from jax import lax
from jax.experimental import pallas as pl
from jax.experimental.pallas import tpu as pltpu


# ----------------------------- kernel body --------------------------------- #
def _se_block_kernel(x_ref,
                     w1m_ref, w10_ref, w1p_ref,
                     w2m_ref, w20_ref, w2p_ref,
                     f1w_ref, f1b_ref, f2w_ref, f2b_ref,
                     o_ref):
    B, H, L = x_ref.shape            # block: (tile_n, H, W*C), lane-dense
    M = B * H

    x3 = x_ref[...]                  # (B, H, L) f32
    x = x3.reshape(M, L)             # rows = (n, y), lanes = x*C + c (free reshape)

    # Row index (mod H) of every flattened row -> border masks for the +-1 row
    # shifts of the 3x3 stencil.  Computed once, shared by both convs.
    row = lax.broadcasted_iota(jnp.int32, (M, 1), 0) % H
    has_up = row != 0                # a row y-1 exists inside the same image
    has_dn = row != H - 1            # a row y+1 exists inside the same image

    def conv3x3(v, wm_ref, w0_ref, wp_ref):
        # v: (M, L) f32.  The W (lane) taps + SAME padding are folded into each
        # (L, L) slab; the H direction is three accumulated matmuls over the
        # row-shifted activations.  Shifts: XLU roll + VPU select (no concats,
        # no patches buffer).  Matmul inputs bf16, accumulation f32.
        vc = v.astype(jnp.bfloat16)
        vu = jnp.where(has_up, pltpu.roll(v, 1, axis=0), 0.0).astype(jnp.bfloat16)
        vd = jnp.where(has_dn, pltpu.roll(v, M - 1, axis=0), 0.0).astype(jnp.bfloat16)
        out = jnp.dot(vu, wm_ref[...], preferred_element_type=jnp.float32)
        out += jnp.dot(vc, w0_ref[...], preferred_element_type=jnp.float32)
        out += jnp.dot(vd, wp_ref[...], preferred_element_type=jnp.float32)
        return out                    # (M, L) f32

    out1 = jnp.maximum(conv3x3(x, w1m_ref, w10_ref, w1p_ref), 0.0)    # conv1+ReLU
    out2 = conv3x3(out1, w2m_ref, w20_ref, w2p_ref)                   # conv2

    # SE gate: fc1 weight already folds the 1/(H*W) average pool and the lane
    # (W) reduction; fc2 weight/bias are tiled across W, so the gate comes out
    # lane-dense and scales out2 directly.  SE math stays f32.
    g = jnp.sum(out2.reshape(B, H, L), axis=1)                         # (B, L)
    h = jnp.maximum(
        jnp.dot(g, f1w_ref[...], preferred_element_type=jnp.float32)
        + f1b_ref[...], 0.0)                                           # (B, R)
    s = jax.nn.sigmoid(
        jnp.dot(h, f2w_ref[...], preferred_element_type=jnp.float32)
        + f2b_ref[...])                                                # (B, L)

    # scale + residual (from the already-loaded lane-dense input) + final ReLU
    o_ref[...] = jnp.maximum(out2.reshape(B, H, L) * s[:, None, :] + x3, 0.0)


# ------------------------ host-side weight repack --------------------------- #
def _conv3x3_row_slabs(w_hwio, W):
    """(3, 3, Cin, Cout) HWIO -> three (W*Cin, W*Cout) lane-dense matrices.

    Slab dy multiplies the activations of input row y + dy - 1; the W-direction
    taps and their SAME zero padding are folded into each slab's band
    structure (out-of-range W taps are simply absent)."""
    w = np.asarray(w_hwio, np.float32)
    KH, KW, Cin, Cout = w.shape
    slabs = []
    for dy in range(KH):
        dense = np.zeros((W, Cin, W, Cout), np.float32)
        for dx in range(KW):
            for xo in range(W):
                xi = xo + dx - 1            # input column feeding this tap
                if 0 <= xi < W:
                    dense[xi, :, xo, :] = w[dy, dx]
        slabs.append(jnp.asarray(dense.reshape(W * Cin, W * Cout), jnp.bfloat16))
    return slabs                             # [row y-1, row y, row y+1]


def prepare_params(w1, w2, f1w, f1b, f2w, f2b, H, W):
    """Repack module parameters into lane-dense form (host-side, numpy)."""
    w1m, w10, w1p = _conv3x3_row_slabs(w1, W)       # conv1: 3 x (W*C, W*C) bf16
    w2m, w20, w2p = _conv3x3_row_slabs(w2, W)       # conv2
    f1 = np.asarray(f1w, np.float32)                # (C, R)
    f2 = np.asarray(f2w, np.float32)                # (R, C)
    f1w_d = jnp.asarray(np.tile(f1, (W, 1)) / float(H * W))          # (W*C, R) pool folded
    f2w_d = jnp.asarray(np.tile(f2, (1, W)))                          # (R, W*C) gate bcast folded
    f1b_d = jnp.asarray(np.asarray(f1b, np.float32).reshape(1, -1))   # (1, R)
    f2b_d = jnp.asarray(np.tile(np.asarray(f2b, np.float32).reshape(1, -1), (1, W)))  # (1, W*C)
    return (w1m, w10, w1p, w2m, w20, w2p, f1w_d, f1b_d, f2w_d, f2b_d)


# ------------------------------ tile sizing --------------------------------- #
def _pick_tile_n(N, H, L):
    """Batch-tile size: ~1 MiB of input activations per grid step, >= 2 grid
    steps whenever N > 1 (v7x megacore), M = tile_n*H aligned to 256 rows when
    that does not inflate the padded batch noticeably."""
    bytes_per_img = H * L * 4
    target = max(1, (1 << 20) // bytes_per_img)       # ~1 MiB of input / step
    if N > 1:
        target = min(target, pl.cdiv(N, 2))           # keep >= 2 grid steps
    target = max(1, min(target, N))
    steps = pl.cdiv(N, target)
    tile_n = pl.cdiv(N, steps)                         # balance the last tile
    if tile_n >= 16:
        aligned = ((tile_n + 15) // 16) * 16           # MXU M alignment (v6e/v7x)
        if pl.cdiv(N, aligned) * aligned - N <= max(N // 8, 0):
            tile_n = aligned
    return tile_n


# ------------------------------- wrapper ------------------------------------ #
@jax.jit
def se_basic_block(x_nhwc, w1m, w10, w1p, w2m, w20, w2p, f1w, f1b, f2w, f2b):
    N, H, W, C = x_nhwc.shape
    L = W * C
    R = f1w.shape[1]

    tile_n = _pick_tile_n(N, H, L)
    grid_n = pl.cdiv(N, tile_n)
    n_pad = grid_n * tile_n

    x_d = x_nhwc.reshape(N, H, L)           # lane-dense view: lanes = x*C + c
    if n_pad != N:
        x_d = jnp.pad(x_d, ((0, n_pad - N), (0, 0), (0, 0)))

    # Weight blocks are constant across grid steps (index_map -> (0, 0)).
    # NOTE: they could be single-buffered (pipeline_mode=pl.Buffered(1)) for a
    # little extra VMEM headroom; left at the default for portability.
    def wspec(shape):
        return pl.BlockSpec(shape, lambda n: (0, 0))

    out = pl.pallas_call(
        _se_block_kernel,
        out_shape=jax.ShapeDtypeStruct((n_pad, H, L), jnp.float32),
        grid_spec=pltpu.PrefetchScalarGridSpec(
            num_scalar_prefetch=0,
            grid=(grid_n,),
            in_specs=[
                pl.BlockSpec((tile_n, H, L), lambda n: (n, 0, 0)),   # x (lane-dense)
                wspec((L, L)), wspec((L, L)), wspec((L, L)),         # conv1 dy-slabs
                wspec((L, L)), wspec((L, L)), wspec((L, L)),         # conv2 dy-slabs
                wspec((L, R)),                                       # fc1 W (pool folded)
                wspec((1, R)),                                       # fc1 b
                wspec((R, L)),                                       # fc2 W (tiled)
                wspec((1, L)),                                       # fc2 b (tiled)
            ],
            out_specs=pl.BlockSpec((tile_n, H, L), lambda n: (n, 0, 0)),
        ),
        compiler_params=pltpu.CompilerParams(
            dimension_semantics=("parallel",),
            vmem_limit_bytes=32 * 1024 * 1024),
    )(x_d, w1m, w10, w1p, w2m, w20, w2p, f1w, f1b, f2w, f2b)

    return out[:N].reshape(N, H, W, C)


# ------------------------------ reference ----------------------------------- #
def _reference(x_nhwc, w1, w2, f1w, f1b, f2w, f2b):
    """Pure-JAX reference with original (un-repacked) parameters."""
    dn = ("NHWC", "HWIO", "NHWC")
    out = lax.conv_general_dilated(x_nhwc, w1, (1, 1), "SAME",
                                   dimension_numbers=dn,
                                   precision=lax.Precision.HIGHEST)
    out = jnp.maximum(out, 0.0)
    out = lax.conv_general_dilated(out, w2, (1, 1), "SAME",
                                   dimension_numbers=dn,
                                   precision=lax.Precision.HIGHEST)
    y = out.mean(axis=(1, 2))                       # (N, C)
    y = jnp.maximum(y @ f1w + f1b, 0.0)             # (N, R)
    y = jax.nn.sigmoid(y @ f2w + f2b)               # (N, C)
    out = out * y[:, None, None, :]
    return jnp.maximum(out + x_nhwc, 0.0)


if __name__ == "__main__":
    # SEBasicBlock(inplanes=planes=8, stride=1, reduction=64 [module default]).
    # C=8, W=16 => lane dim W*C = 128 (fully lane-dense working layout).
    N, C, H, W, R = 2, 8, 16, 16, 64

    key = jax.random.PRNGKey(0)
    kx, k1, k2, k3, k4, k5, k6 = jax.random.split(key, 7)

    # PyTorch-style input is NCHW; convert to NHWC for the kernel.
    x_nchw = jax.random.normal(kx, (N, C, H, W), jnp.float32)
    x_nhwc = jnp.transpose(x_nchw, (0, 2, 3, 1))

    # Deterministic synthetic parameters (no checkpoint loading).
    w1 = 0.1 * jax.random.normal(k1, (3, 3, C, C), jnp.float32)   # conv1, HWIO
    w2 = 0.1 * jax.random.normal(k2, (3, 3, C, C), jnp.float32)   # conv2, HWIO
    f1w = 0.1 * jax.random.normal(k3, (C, R), jnp.float32)        # Linear(C->R)
    f1b = 0.1 * jax.random.normal(k4, (1, R), jnp.float32)
    f2w = 0.1 * jax.random.normal(k5, (R, C), jnp.float32)        # Linear(R->C)
    f2b = 0.1 * jax.random.normal(k6, (1, C), jnp.float32)

    params = prepare_params(w1, w2, f1w, f1b, f2w, f2b, H, W)
    out = se_basic_block(x_nhwc, *params)
    out = jax.block_until_ready(out)

    ref = _reference(x_nhwc, w1, w2, f1w, f1b, f2w, f2b)
    assert out.shape == (N, H, W, C)
    err = float(jnp.max(jnp.abs(out - ref)))
    # bf16 MXU inputs on the conv path (f32 accumulate) -> a few 1e-3 abs error
    # against the f32 reference; tolerance widened accordingly.
    assert jnp.allclose(out, ref, rtol=2e-2, atol=2e-2), err

    print("KERNEL_OK")
</pallas_src>

<mosaic_0001>
module attributes {stable_mosaic.version = 11 : i64} {
  func.func @_se_block_kernel(%arg0: i32, %arg1: memref<1x16x128xf32, #tpu.memory_space<vmem>>, %arg2: memref<128x128xbf16, #tpu.memory_space<vmem>>, %arg3: memref<128x128xbf16, #tpu.memory_space<vmem>>, %arg4: memref<128x128xbf16, #tpu.memory_space<vmem>>, %arg5: memref<128x128xbf16, #tpu.memory_space<vmem>>, %arg6: memref<128x128xbf16, #tpu.memory_space<vmem>>, %arg7: memref<128x128xbf16, #tpu.memory_space<vmem>>, %arg8: memref<128x64xf32, #tpu.memory_space<vmem>>, %arg9: memref<1x64xf32, #tpu.memory_space<vmem>>, %arg10: memref<64x128xf32, #tpu.memory_space<vmem>>, %arg11: memref<1x128xf32, #tpu.memory_space<vmem>>, %arg12: memref<1x16x128xf32, #tpu.memory_space<vmem>>) attributes {dimension_semantics = [#tpu.dimension_semantics<parallel>], iteration_bounds = array<i64: 2>, scalar_prefetch = 0 : i64, scratch_operands = 0 : i64, tpu.core_type = #tpu.core_type<tc>, window_params = [{transform_indices = @transform_0, window_bounds = array<i64: 1, 16, 128>}, {pipeline_mode = #tpu.pipeline_mode<synchronous>, transform_indices = @transform_1, window_bounds = array<i64: 128, 128>}, {pipeline_mode = #tpu.pipeline_mode<synchronous>, transform_indices = @transform_2, window_bounds = array<i64: 128, 128>}, {pipeline_mode = #tpu.pipeline_mode<synchronous>, transform_indices = @transform_3, window_bounds = array<i64: 128, 128>}, {pipeline_mode = #tpu.pipeline_mode<synchronous>, transform_indices = @transform_4, window_bounds = array<i64: 128, 128>}, {pipeline_mode = #tpu.pipeline_mode<synchronous>, transform_indices = @transform_5, window_bounds = array<i64: 128, 128>}, {pipeline_mode = #tpu.pipeline_mode<synchronous>, transform_indices = @transform_6, window_bounds = array<i64: 128, 128>}, {pipeline_mode = #tpu.pipeline_mode<synchronous>, transform_indices = @transform_7, window_bounds = array<i64: 128, 64>}, {pipeline_mode = #tpu.pipeline_mode<synchronous>, transform_indices = @transform_8, window_bounds = array<i64: 1, 64>}, {pipeline_mode = #tpu.pipeline_mode<synchronous>, transform_indices = @transform_9, window_bounds = array<i64: 64, 128>}, {pipeline_mode = #tpu.pipeline_mode<synchronous>, transform_indices = @transform_10, window_bounds = array<i64: 1, 128>}, {transform_indices = @transform_11, window_bounds = array<i64: 1, 16, 128>}]} {
    %c0 = arith.constant 0 : index
    %c0_0 = arith.constant 0 : index
    %c0_1 = arith.constant 0 : index
    %0 = vector.load %arg1[%c0, %c0_0, %c0_1] : memref<1x16x128xf32, #tpu.memory_space<vmem>>, vector<1x16x128xf32>
    %1 = vector.shape_cast %0 : vector<1x16x128xf32> to vector<16x128xf32>
    %2 = tpu.iota {dimensions = array<i32: 0>} : vector<16x1xi32>
    %c16_i32 = arith.constant 16 : i32
    %c0_i32 = arith.constant 0 : i32
    %3 = arith.cmpi eq, %c16_i32, %c0_i32 : i32
    %c1_i32 = arith.constant 1 : i32
    %4 = arith.select %3, %c1_i32, %c16_i32 : i32
    %5 = vector.broadcast %4 : i32 to vector<16x1xi32>
    %6 = arith.remsi %2, %5 : vector<16x1xi32>
    %c0_i32_2 = arith.constant 0 : i32
    %7 = vector.broadcast %c0_i32_2 : i32 to vector<16x1xi32>
    %8 = arith.cmpi ne, %6, %7 : vector<16x1xi32>
    %c0_i32_3 = arith.constant 0 : i32
    %9 = vector.broadcast %c0_i32_3 : i32 to vector<16x1xi32>
    %10 = arith.cmpi slt, %6, %9 : vector<16x1xi32>
    %c0_i32_4 = arith.constant 0 : i32
    %11 = arith.cmpi slt, %4, %c0_i32_4 : i32
    %12 = vector.broadcast %11 : i1 to vector<16x1xi1>
    %13 = vector.broadcast %12 : vector<16x1xi1> to vector<16x1xi1>
    %14 = arith.xori %10, %13 : vector<16x1xi1>
    %15 = arith.andi %14, %8 : vector<16x1xi1>
    %16 = vector.broadcast %4 : i32 to vector<16x1xi32>
    %17 = arith.addi %6, %16 : vector<16x1xi32>
    %18 = arith.select %15, %17, %6 : vector<16x1xi1>, vector<16x1xi32>
    %c0_i32_5 = arith.constant 0 : i32
    %19 = vector.broadcast %c0_i32_5 : i32 to vector<16x1xi32>
    %20 = arith.cmpi ne, %18, %19 : vector<16x1xi32>
    %c15_i32 = arith.constant 15 : i32
    %21 = vector.broadcast %c15_i32 : i32 to vector<16x1xi32>
    %22 = arith.cmpi ne, %18, %21 : vector<16x1xi32>
    %23 = arith.truncf %1 : vector<16x128xf32> to vector<16x128xbf16>
    %c1_i32_6 = arith.constant 1 : i32
    %24 = tpu.dynamic_rotate %1 by %c1_i32_6 dim 0 : vector<16x128xf32>, i32 -> vector<16x128xf32>
    %cst = arith.constant 0.000000e+00 : f32
    %25 = vector.shape_cast %20 : vector<16x1xi1> to vector<16x1xi1>
    %26 = vector.broadcast %25 : vector<16x1xi1> to vector<16x128xi1>
    %27 = vector.broadcast %cst : f32 to vector<16x128xf32>
    %28 = arith.select %26, %24, %27 : vector<16x128xi1>, vector<16x128xf32>
    %29 = arith.truncf %28 : vector<16x128xf32> to vector<16x128xbf16>
    %c15_i32_7 = arith.constant 15 : i32
    %30 = tpu.dynamic_rotate %1 by %c15_i32_7 dim 0 : vector<16x128xf32>, i32 -> vector<16x128xf32>
    %cst_8 = arith.constant 0.000000e+00 : f32
    %31 = vector.shape_cast %22 : vector<16x1xi1> to vector<16x1xi1>
    %32 = vector.broadcast %31 : vector<16x1xi1> to vector<16x128xi1>
    %33 = vector.broadcast %cst_8 : f32 to vector<16x128xf32>
    %34 = arith.select %32, %30, %33 : vector<16x128xi1>, vector<16x128xf32>
    %35 = arith.truncf %34 : vector<16x128xf32> to vector<16x128xbf16>
    %c0_9 = arith.constant 0 : index
    %c0_10 = arith.constant 0 : index
    %36 = vector.load %arg2[%c0_9, %c0_10] : memref<128x128xbf16, #tpu.memory_space<vmem>>, vector<128x128xbf16>
    %cst_11 = arith.constant dense<0.000000e+00> : vector<16x128xf32>
    %37 = tpu.matmul %29, %36, %cst_11 {dimension_numbers = #tpu.dot_dimension_numbers<[1], [0], [0], [1], [0, 0, 1, 1], [], []>} : vector<16x128xbf16>, vector<128x128xbf16>, vector<16x128xf32> -> vector<16x128xf32>
    %c0_12 = arith.constant 0 : index
    %c0_13 = arith.constant 0 : index
    %38 = vector.load %arg3[%c0_12, %c0_13] : memref<128x128xbf16, #tpu.memory_space<vmem>>, vector<128x128xbf16>
    %cst_14 = arith.constant dense<0.000000e+00> : vector<16x128xf32>
    %39 = tpu.matmul %23, %38, %cst_14 {dimension_numbers = #tpu.dot_dimension_numbers<[1], [0], [0], [1], [0, 0, 1, 1], [], []>} : vector<16x128xbf16>, vector<128x128xbf16>, vector<16x128xf32> -> vector<16x128xf32>
    %40 = arith.addf %37, %39 : vector<16x128xf32>
    %c0_15 = arith.constant 0 : index
    %c0_16 = arith.constant 0 : index
    %41 = vector.load %arg4[%c0_15, %c0_16] : memref<128x128xbf16, #tpu.memory_space<vmem>>, vector<128x128xbf16>
    %cst_17 = arith.constant dense<0.000000e+00> : vector<16x128xf32>
    %42 = tpu.matmul %35, %41, %cst_17 {dimension_numbers = #tpu.dot_dimension_numbers<[1], [0], [0], [1], [0, 0, 1, 1], [], []>} : vector<16x128xbf16>, vector<128x128xbf16>, vector<16x128xf32> -> vector<16x128xf32>
    %43 = arith.addf %40, %42 : vector<16x128xf32>
    %cst_18 = arith.constant 0.000000e+00 : f32
    %44 = vector.broadcast %cst_18 : f32 to vector<16x128xf32>
    %45 = arith.maximumf %43, %44 : vector<16x128xf32>
    %46 = arith.truncf %45 : vector<16x128xf32> to vector<16x128xbf16>
    %c1_i32_19 = arith.constant 1 : i32
    %47 = tpu.dynamic_rotate %45 by %c1_i32_19 dim 0 : vector<16x128xf32>, i32 -> vector<16x128xf32>
    %cst_20 = arith.constant 0.000000e+00 : f32
    %48 = vector.shape_cast %20 : vector<16x1xi1> to vector<16x1xi1>
    %49 = vector.broadcast %48 : vector<16x1xi1> to vector<16x128xi1>
    %50 = vector.broadcast %cst_20 : f32 to vector<16x128xf32>
    %51 = arith.select %49, %47, %50 : vector<16x128xi1>, vector<16x128xf32>
    %52 = arith.truncf %51 : vector<16x128xf32> to vector<16x128xbf16>
    %c15_i32_21 = arith.constant 15 : i32
    %53 = tpu.dynamic_rotate %45 by %c15_i32_21 dim 0 : vector<16x128xf32>, i32 -> vector<16x128xf32>
    %cst_22 = arith.constant 0.000000e+00 : f32
    %54 = vector.shape_cast %22 : vector<16x1xi1> to vector<16x1xi1>
    %55 = vector.broadcast %54 : vector<16x1xi1> to vector<16x128xi1>
    %56 = vector.broadcast %cst_22 : f32 to vector<16x128xf32>
    %57 = arith.select %55, %53, %56 : vector<16x128xi1>, vector<16x128xf32>
    %58 = arith.truncf %57 : vector<16x128xf32> to vector<16x128xbf16>
    %c0_23 = arith.constant 0 : index
    %c0_24 = arith.constant 0 : index
    %59 = vector.load %arg5[%c0_23, %c0_24] : memref<128x128xbf16, #tpu.memory_space<vmem>>, vector<128x128xbf16>
    %cst_25 = arith.constant dense<0.000000e+00> : vector<16x128xf32>
    %60 = tpu.matmul %52, %59, %cst_25 {dimension_numbers = #tpu.dot_dimension_numbers<[1], [0], [0], [1], [0, 0, 1, 1], [], []>} : vector<16x128xbf16>, vector<128x128xbf16>, vector<16x128xf32> -> vector<16x128xf32>
    %c0_26 = arith.constant 0 : index
    %c0_27 = arith.constant 0 : index
    %61 = vector.load %arg6[%c0_26, %c0_27] : memref<128x128xbf16, #tpu.memory_space<vmem>>, vector<128x128xbf16>
    %cst_28 = arith.constant dense<0.000000e+00> : vector<16x128xf32>
    %62 = tpu.matmul %46, %61, %cst_28 {dimension_numbers = #tpu.dot_dimension_numbers<[1], [0], [0], [1], [0, 0, 1, 1], [], []>} : vector<16x128xbf16>, vector<128x128xbf16>, vector<16x128xf32> -> vector<16x128xf32>
    %63 = arith.addf %60, %62 : vector<16x128xf32>
    %c0_29 = arith.constant 0 : index
    %c0_30 = arith.constant 0 : index
    %64 = vector.load %arg7[%c0_29, %c0_30] : memref<128x128xbf16, #tpu.memory_space<vmem>>, vector<128x128xbf16>
    %cst_31 = arith.constant dense<0.000000e+00> : vector<16x128xf32>
    %65 = tpu.matmul %58, %64, %cst_31 {dimension_numbers = #tpu.dot_dimension_numbers<[1], [0], [0], [1], [0, 0, 1, 1], [], []>} : vector<16x128xbf16>, vector<128x128xbf16>, vector<16x128xf32> -> vector<16x128xf32>
    %66 = arith.addf %63, %65 : vector<16x128xf32>
    %67 = vector.shape_cast %66 : vector<16x128xf32> to vector<1x16x128xf32>
    %cst_32 = arith.constant dense<0.000000e+00> : vector<1x128xf32>
    %68 = vector.multi_reduction <add>, %67, %cst_32 [1] : vector<1x16x128xf32> to vector<1x128xf32>
    %c0_33 = arith.constant 0 : index
    %c0_34 = arith.constant 0 : index
    %69 = vector.load %arg8[%c0_33, %c0_34] : memref<128x64xf32, #tpu.memory_space<vmem>>, vector<128x64xf32>
    %cst_35 = arith.constant dense<0.000000e+00> : vector<1x64xf32>
    %70 = tpu.matmul %68, %69, %cst_35 {dimension_numbers = #tpu.dot_dimension_numbers<[1], [0], [0], [1], [0, 0, 1, 1], [], []>} : vector<1x128xf32>, vector<128x64xf32>, vector<1x64xf32> -> vector<1x64xf32>
    %c0_36 = arith.constant 0 : index
    %c0_37 = arith.constant 0 : index
    %71 = vector.load %arg9[%c0_36, %c0_37] : memref<1x64xf32, #tpu.memory_space<vmem>>, vector<1x64xf32>
    %72 = arith.addf %70, %71 : vector<1x64xf32>
    %cst_38 = arith.constant 0.000000e+00 : f32
    %73 = vector.broadcast %cst_38 : f32 to vector<1x64xf32>
    %74 = arith.maximumf %72, %73 : vector<1x64xf32>
    %c0_39 = arith.constant 0 : index
    %c0_40 = arith.constant 0 : index
    %75 = vector.load %arg10[%c0_39, %c0_40] : memref<64x128xf32, #tpu.memory_space<vmem>>, vector<64x128xf32>
    %cst_41 = arith.constant dense<0.000000e+00> : vector<1x128xf32>
    %76 = tpu.matmul %74, %75, %cst_41 {dimension_numbers = #tpu.dot_dimension_numbers<[1], [0], [0], [1], [0, 0, 1, 1], [], []>} : vector<1x64xf32>, vector<64x128xf32>, vector<1x128xf32> -> vector<1x128xf32>
    %c0_42 = arith.constant 0 : index
    %c0_43 = arith.constant 0 : index
    %77 = vector.load %arg11[%c0_42, %c0_43] : memref<1x128xf32, #tpu.memory_space<vmem>>, vector<1x128xf32>
    %78 = arith.addf %76, %77 : vector<1x128xf32>
    %79 = arith.negf %78 : vector<1x128xf32>
    %80 = math.exp %79 : vector<1x128xf32>
    %cst_44 = arith.constant 1.000000e+00 : f32
    %81 = vector.broadcast %cst_44 : f32 to vector<1x128xf32>
    %82 = arith.addf %81, %80 : vector<1x128xf32>
    %83 = arith.divf %81, %82 : vector<1x128xf32>
    %84 = vector.shape_cast %66 : vector<16x128xf32> to vector<1x16x128xf32>
    %85 = vector.shape_cast %83 : vector<1x128xf32> to vector<1x1x128xf32>
    %86 = vector.broadcast %85 : vector<1x1x128xf32> to vector<1x16x128xf32>
    %87 = arith.mulf %84, %86 : vector<1x16x128xf32>
    %88 = arith.addf %87, %0 : vector<1x16x128xf32>
    %cst_45 = arith.constant 0.000000e+00 : f32
    %89 = vector.broadcast %cst_45 : f32 to vector<1x16x128xf32>
    %90 = arith.maximumf %88, %89 : vector<1x16x128xf32>
    %c0_46 = arith.constant 0 : index
    %c0_47 = arith.constant 0 : index
    %c0_48 = arith.constant 0 : index
    %91 = vector.load %arg12[%c0_46, %c0_47, %c0_48] : memref<1x16x128xf32, #tpu.memory_space<vmem>>, vector<1x16x128xf32>
    tpu.vector_store %arg12[%c0_46, %c0_47, %c0_48], %90 {strides = array<i32>} : memref<1x16x128xf32, #tpu.memory_space<vmem>>, vector<1x16x128xf32>,
    return
  }
  func.func @transform_0(%arg0: i32) -> (i32, i32, i32) {
    %c0_i32 = arith.constant 0 : i32
    %c0_i32_0 = arith.constant 0 : i32
    %c0_i32_1 = arith.constant 0 : i32
    return %arg0, %c0_i32, %c0_i32_0 : i32, i32, i32
  }
  func.func @transform_1(%arg0: i32) -> (i32, i32) {
    %c0_i32 = arith.constant 0 : i32
    %c0_i32_0 = arith.constant 0 : i32
    %c0_i32_1 = arith.constant 0 : i32
    return %c0_i32, %c0_i32_0 : i32, i32
  }
  func.func @transform_2(%arg0: i32) -> (i32, i32) {
    %c0_i32 = arith.constant 0 : i32
    %c0_i32_0 = arith.constant 0 : i32
    %c0_i32_1 = arith.constant 0 : i32
    return %c0_i32, %c0_i32_0 : i32, i32
  }
  func.func @transform_3(%arg0: i32) -> (i32, i32) {
    %c0_i32 = arith.constant 0 : i32
    %c0_i32_0 = arith.constant 0 : i32
    %c0_i32_1 = arith.constant 0 : i32
    return %c0_i32, %c0_i32_0 : i32, i32
  }
  func.func @transform_4(%arg0: i32) -> (i32, i32) {
    %c0_i32 = arith.constant 0 : i32
    %c0_i32_0 = arith.constant 0 : i32
    %c0_i32_1 = arith.constant 0 : i32
    return %c0_i32, %c0_i32_0 : i32, i32
  }
  func.func @transform_5(%arg0: i32) -> (i32, i32) {
    %c0_i32 = arith.constant 0 : i32
    %c0_i32_0 = arith.constant 0 : i32
    %c0_i32_1 = arith.constant 0 : i32
    return %c0_i32, %c0_i32_0 : i32, i32
  }
  func.func @transform_6(%arg0: i32) -> (i32, i32) {
    %c0_i32 = arith.constant 0 : i32
    %c0_i32_0 = arith.constant 0 : i32
    %c0_i32_1 = arith.constant 0 : i32
    return %c0_i32, %c0_i32_0 : i32, i32
  }
  func.func @transform_7(%arg0: i32) -> (i32, i32) {
    %c0_i32 = arith.constant 0 : i32
    %c0_i32_0 = arith.constant 0 : i32
    %c0_i32_1 = arith.constant 0 : i32
    return %c0_i32, %c0_i32_0 : i32, i32
  }
  func.func @transform_8(%arg0: i32) -> (i32, i32) {
    %c0_i32 = arith.constant 0 : i32
    %c0_i32_0 = arith.constant 0 : i32
    %c0_i32_1 = arith.constant 0 : i32
    return %c0_i32, %c0_i32_0 : i32, i32
  }
  func.func @transform_9(%arg0: i32) -> (i32, i32) {
    %c0_i32 = arith.constant 0 : i32
    %c0_i32_0 = arith.constant 0 : i32
    %c0_i32_1 = arith.constant 0 : i32
    return %c0_i32, %c0_i32_0 : i32, i32
  }
  func.func @transform_10(%arg0: i32) -> (i32, i32) {
    %c0_i32 = arith.constant 0 : i32
    %c0_i32_0 = arith.constant 0 : i32
    %c0_i32_1 = arith.constant 0 : i32
    return %c0_i32, %c0_i32_0 : i32, i32
  }
  func.func @transform_11(%arg0: i32) -> (i32, i32, i32) {
    %c0_i32 = arith.constant 0 : i32
    %c0_i32_0 = arith.constant 0 : i32
    %c0_i32_1 = arith.constant 0 : i32
    return %arg0, %c0_i32, %c0_i32_0 : i32, i32, i32
  }
}

</mosaic_0001>

<bundles_post_ra>
// kernel: se_basic_block.1
= control target key start
LH: loop header
LB: loop body
LE: loop exit
PB: predicated region body
PF: predicated region fallthrough
CT: control target
= control target key end

     0   :  { %s1865_s17 = smov 0   ;;  %s2240_s0 = inlined_call_operand.vmem [shape: f32[2,16,128], index: 0, kind: input, shape index: {}]   ;;  %s2241_s1 = inlined_call_operand.vmem [shape: bf16[128,128], index: 1, kind: input, shape index: {}]   ;;  %s2242_s2 = inlined_call_operand.vmem [shape: bf16[128,128], index: 2, kind: input, shape index: {}]   ;;  %s2243_s3 = inlined_call_operand.vmem [shape: bf16[128,128], index: 3, kind: input, shape index: {}]   ;;  %s2244_s4 = inlined_call_operand.vmem [shape: bf16[128,128], index: 4, kind: input, shape index: {}]   ;;  %s2245_s5 = inlined_call_operand.vmem [shape: bf16[128,128], index: 5, kind: input, shape index: {}]   ;;  %s2246_s6 = inlined_call_operand.vmem [shape: bf16[128,128], index: 6, kind: input, shape index: {}]   ;;  %s2247_s7 = inlined_call_operand.vmem [shape: f32[128,64], index: 7, kind: input, shape index: {}]   ;;  %s2248_s8 = inlined_call_operand.vmem [shape: f32[1,64], index: 8, kind: input, shape index: {}]   ;;  %s2249_s9 = inlined_call_operand.vmem [shape: f32[64,128], index: 9, kind: input, shape index: {}]   ;;  %s2250_s10 = inlined_call_operand.vmem [shape: f32[1,128], index: 10, kind: input, shape index: {}]   ;;  %s2251_s11 = inlined_call_operand.vmem [shape: f32[2,16,128], index: 11, kind: output, shape index: {}]  }
   0x1 LB: > { %s1348_s18 = sadd.s32 4294967295, %s1799_s17   ;;  %p1352_p0 = scmp.ge.s32.totalorder %s1799_s17, 1  ;;  %s1799_s17 = sphi %s1865_s17, %s21_s17  }
   0x2   : > { %p337_p1 = scmp.lt.s32.totalorder %s1799_s17, 3 }
   0x4   : > { %p338_p2 = pnand %p1352_p0, %p337_p1 }
   0x5   : > { %v1741_v0 = vld [vmem:[%s2242_s2] sm:$0xff] (!%p338_p2)   ;;  %v1801_v1 = vmov (!%p338_p2), 0.0   ;;  %v1742_v2 = vld [vmem:[%s2242_s2 + $0x8] sm:$0xff] (!%p338_p2)   ;;  %vm1802_vm0 = vmmov (!%p338_p2), 0   ;;  %v1743_v3 = vld [vmem:[%s2242_s2 + $0x10] sm:$0xff] (!%p338_p2)   ;;  %p377_p3 = scmp.lt.s32.totalorder (!%p338_p2), %s1348_s18, 1  ;;  %v390_v23 = vlaneseq (!%p338_p2) }
   0x6   : > { %341 = sbr.rel (%p338_p2) target bundleno = 1077 (0x435), region = 64  ;;  %1503 = vmatprep.subr.bf16.mxu0 (!%p338_p2), %v1801_v1  ;;  %1563 = vmatprep.subr.bf16.mxu1 (!%p338_p2), %v1801_v1  ;;  %v1744_v4 = vld [vmem:[%s2242_s2 + $0x18] sm:$0xff] (!%p338_p2)   ;;  %v1745_v5 = vld [vmem:[%s2242_s2 + $0x20] sm:$0xff] (!%p338_p2)   ;;  %v1746_v6 = vld [vmem:[%s2242_s2 + $0x28] sm:$0xff] (!%p338_p2)   ;;  %vm1803_vm3 = vmmov (!%p338_p2), 1   ;;  %v1804_v56 = vmov (!%p338_p2), 0.0|0.0  }
   0x7   : > { %1504 = vmatpush3.bf16.msra.mxu0 (!%p338_p2), %v1741_v0  ;;  %1519 = vmatprep.mubr.msk.bf16.mxu0 (!%p338_p2), %vm1802_vm0, %v1801_v1  ;;  %v1747_v7 = vld [vmem:[%s2242_s2 + $0x30] sm:$0xff] (!%p338_p2)   ;;  %v1748_v8 = vld [vmem:[%s2242_s2 + $0x38] sm:$0xff] (!%p338_p2)   ;;  %v1765_v11 = vld [vmem:[%s2245_s5] sm:$0xff] (!%p338_p2)   ;;  %v1977_v26 = vshrl.u32 (!%p338_p2), %v390_v23, 7  ;;  %vm1201_vm8 = vcmask (!%p338_p2), 523264  }
   0x8   : > { %1505 = vmatprep.subr.bf16.mxu0 (!%p338_p2), %v1801_v1  ;;  %1579 = vmatprep.mubr.msk.bf16.mxu1 (!%p338_p2), %vm1802_vm0, %v1801_v1  ;;  %v1766_v12 = vld [vmem:[%s2245_s5 + $0x8] sm:$0xff] (!%p338_p2)   ;;  %v1749_v14 = vld [vmem:[%s2241_s1] sm:$0xff] (!%p338_p2)   ;;  %v1767_v16 = vld [vmem:[%s2245_s5 + $0x10] sm:$0xff] (!%p338_p2)  }
   0x9   : > { %1564 = vmatpush3.bf16.msra.mxu1 (!%p338_p2), %v1765_v11  ;;  %v1750_v15 = vld [vmem:[%s2241_s1 + $0x8] sm:$0xff] (!%p338_p2)   ;;  %v1768_v17 = vld [vmem:[%s2245_s5 + $0x18] sm:$0xff] (!%p338_p2)   ;;  %v1751_v18 = vld [vmem:[%s2241_s1 + $0x10] sm:$0xff] (!%p338_p2)   ;;  %v397_v30 = vand.u32 (!%p338_p2), 15, %v1977_v26  ;;  %vm424_vm1 = vcmp.lt.s32.totalorder (!%p338_p2), %v1977_v26, 1  ;;  %v392_v42 = vadd.s32 (!%p338_p2), 8, %v1977_v26 }
   0xa   : > { %1565 = vmatprep.subr.bf16.mxu1 (!%p338_p2), %v1801_v1  ;;  %v1769_v19 = vld [vmem:[%s2245_s5 + $0x20] sm:$0xff] (!%p338_p2)   ;;  %v1752_v20 = vld [vmem:[%s2241_s1 + $0x18] sm:$0xff] (!%p338_p2)   ;;  %v1770_v21 = vld [vmem:[%s2245_s5 + $0x28] sm:$0xff] (!%p338_p2)   ;;  %vm436_vm5 = vcmp.lt.s32.totalorder (!%p338_p2), %v1977_v26, 7 }
   0xb   : > { %1506 = vmatpush3.bf16.msra.mxu0 (!%p338_p2), %v1742_v2  ;;  %v1753_v22 = vld [vmem:[%s2241_s1 + $0x20] sm:$0xff] (!%p338_p2)   ;;  %v1771_v24 = vld [vmem:[%s2245_s5 + $0x30] sm:$0xff] (!%p338_p2)   ;;  %v1754_v25 = vld [vmem:[%s2241_s1 + $0x28] sm:$0xff] (!%p338_p2)   ;;  %vm417_vm2 = vcmp.ne.s32.totalorder (!%p338_p2), %v397_v30, 0  ;;  %v404_v46 = vand.u32 (!%p338_p2), 15, %v392_v42 }
   0xc   : > { %1507 = vmatprep.subr.bf16.mxu0 (!%p338_p2), %v1801_v1  ;;  %v1755_v29 = vld [vmem:[%s2241_s1 + $0x30] sm:$0xff] (!%p338_p2)   ;;  %v1756_v31 = vld [vmem:[%s2241_s1 + $0x38] sm:$0xff] (!%p338_p2)   ;;  %vm1997_vm4 = vmpackc.low (!%p338_p2), %vm1803_vm3, %vm417_vm2 }
   0xd   : > { %s2257_s18 = smov (!%p377_p3, %s1348_s18), 1  ;;  %1566 = vmatpush3.bf16.msra.mxu1 %v1766_v12  ;;  %v1757_v36 = vld [vmem:[%s2243_s3] sm:$0xff]   ;;  %v1758_v37 = vld [vmem:[%s2243_s3 + $0x8] sm:$0xff]   ;;  %v1759_v38 = vld [vmem:[%s2243_s3 + $0x10] sm:$0xff]   ;;  %vm420_vm6 = vcmp.ne.s32.totalorder %v404_v46, 15 }
   0xe   : > { %s1421_s12 = sshll.u32 %s2257_s18, 4  ;;  %1567 = vmatprep.subr.bf16.mxu1 %v1801_v1  ;;  %v1760_v39 = vld [vmem:[%s2243_s3 + $0x18] sm:$0xff]   ;;  %v1761_v40 = vld [vmem:[%s2243_s3 + $0x20] sm:$0xff]   ;;  %v1762_v41 = vld [vmem:[%s2243_s3 + $0x28] sm:$0xff]  }
   0xf   : > { %1508 = vmatpush3.bf16.msra.mxu0 %v1743_v3  ;;  %s381_s15 = scalar_lea.vmem %s2240_s0, %s1421_s12  ;;  %v1763_v45 = vld [vmem:[%s2243_s3 + $0x30] sm:$0xff]   ;;  %v1764_v47 = vld [vmem:[%s2243_s3 + $0x38] sm:$0xff]   ;;  %vm2046_vm7 = vmpackc.low %vm420_vm6, %vm1803_vm3  ;;  %s386_s28 = scalar_lea.vmem %s2251_s11, %s1421_s12 }
  0x10   : > { %1509 = vmatprep.subr.bf16.mxu0 %v1801_v1  ;;  %v1917_v9 = vld [vmem:[%s381_s15] sm:$0xff]  ;;  %v1919_v10 = vld [vmem:[%s381_s15 + $0x8] sm:$0xff]  ;;  %v1772_v52 = vld [vmem:[%s2245_s5 + $0x38] sm:$0xff]  }
  0x11   : > { %v421_v13 = vpack.c.bf16 %v1919_v10, %v1917_v9  ;;  %1568 = vmatpush3.bf16.msra.mxu1 %v1767_v16  ;;  %v422_v27 = vrot.slane %v1917_v9, 7  ;;  %v423_v28 = vrot.slane %v1919_v10, 7  ;;  %v434_v43 = vrot.slane %v1917_v9, 1  ;;  %v1104_v53 = vld [vmem:[%s2247_s7] sm:$0xff]  ;;  %v1105_v54 = vld [vmem:[%s2247_s7 + $0x8] sm:$0xff]  ;;  %v1106_v55 = vld [vmem:[%s2247_s7 + $0x10] sm:$0xff] }
  0x12   : > { %1569 = vmatprep.subr.bf16.mxu1 %v1801_v1  ;;  %v435_v44 = vrot.slane %v1919_v10, 1  ;;  %v1678_v57 = vpack.c.bf16 %v1105_v54, %v1104_v53  ;;  %v1107_v58 = vld [vmem:[%s2247_s7 + $0x18] sm:$0xff]  ;;  %v1108_v60 = vld [vmem:[%s2247_s7 + $0x20] sm:$0xff]  ;;  %v1109_v61 = vld [vmem:[%s2247_s7 + $0x28] sm:$0xff] }
  0x13   : > { %1510 = vmatpush3.bf16.msra.mxu0 %v1744_v4  ;;  %v425_v32 = vsel %vm424_vm1, %v422_v27, %v423_v28  ;;  %v426_v33 = vsel %vm424_vm1, %v423_v28, %v422_v27  ;;  %v1681_v59 = vpack.c.bf16 %v1107_v58, %v1106_v55  ;;  %v1684_v62 = vpack.c.bf16 %v1109_v61, %v1108_v60  ;;  %v1110_v63 = vld [vmem:[%s2247_s7 + $0x30] sm:$0xff]  ;;  %v1111_v0 = vld [vmem:[%s2247_s7 + $0x38] sm:$0xff]  ;;  %v1773_v12 = vld [vmem:[%s2244_s4] sm:$0xff]  }
  0x14   : > { %1511 = vmatprep.subr.bf16.mxu0 %v1801_v1  ;;  %v1374_v34 = vpack.c.bf16 %v425_v32, %v426_v33  ;;  %v437_v48 = vsel %vm436_vm5, %v434_v43, %v435_v44  ;;  %v438_v49 = vsel %vm436_vm5, %v435_v44, %v434_v43  ;;  %v1687_v2 = vpack.c.bf16 %v1111_v0, %v1110_v63  ;;  %v1774_v23 = vld [vmem:[%s2244_s4 + $0x8] sm:$0xff]   ;;  %v1777_v27 = vld [vmem:[%s2244_s4 + $0x20] sm:$0xff]   ;;  %v1780_v30 = vld [vmem:[%s2244_s4 + $0x38] sm:$0xff]  }
  0x15   : > { %1570 = vmatpush3.bf16.msra.mxu1 %v1768_v17  ;;  %v1385_v50 = vpack.c.bf16 %v438_v49, %v437_v48  ;;  %v1778_v28 = vld [vmem:[%s2244_s4 + $0x28] sm:$0xff]   ;;  %v1783_v33 = vld [vmem:[%s2246_s6 + $0x10] sm:$0xff]   ;;  %v1785_v35 = vld [vmem:[%s2246_s6 + $0x20] sm:$0xff]  }
  0x16   : > { %1571 = vmatprep.subr.bf16.mxu1 %v1801_v1  ;;  %v1782_v32 = vld [vmem:[%s2246_s6 + $0x8] sm:$0xff]   ;;  %v1114_v42 = vld [vmem:[%s2247_s7 + $0x50] sm:$0xff]  ;;  %v1116_v44 = vld [vmem:[%s2247_s7 + $0x60] sm:$0xff] }
  0x17   : > { %1512 = vmatpush3.bf16.msra.mxu0 %v1745_v5  ;;  %v1119_v48 = vld [vmem:[%s2247_s7 + $0x78] sm:$0xff]  ;;  %v1193_v51 = vld [vmem:[%s2249_s9 + $0x8] sm:$0xff] }
  0x18   : > { %1513 = vmatprep.subr.bf16.mxu0 %v1801_v1  ;;  %v1195_v54 = vld [vmem:[%s2249_s9 + $0x18] sm:$0xff]  ;;  %v1197_v58 = vld [vmem:[%s2249_s9 + $0x28] sm:$0xff] }
  0x19   : > { %1572 = vmatpush3.bf16.msra.mxu1 %v1769_v19 }
  0x1a   : > { %1573 = vmatprep.subr.bf16.mxu1 %v1801_v1 }
  0x1b   : > { %1514 = vmatpush3.bf16.msra.mxu0 %v1746_v6 }
  0x1c   : > { %1515 = vmatprep.subr.bf16.mxu0 %v1801_v1 }
  0x1d   : > { %1574 = vmatpush3.bf16.msra.mxu1 %v1770_v21 }
  0x1e   : > { %1575 = vmatprep.subr.bf16.mxu1 %v1801_v1 }
  0x1f   : > { %1516 = vmatpush3.bf16.msra.mxu0 %v1747_v7 }
  0x20   : > { %1517 = vmatprep.subr.bf16.mxu0 %v1801_v1 }
  0x21   : > { %1576 = vmatpush3.bf16.msra.mxu1 %v1771_v24  ;;  %v1775_v24 = vld [vmem:[%s2244_s4 + $0x10] sm:$0xff]  }
  0x22   : > { %1577 = vmatprep.subr.bf16.mxu1 %v1801_v1 }
  0x23   : > { %1518 = vmatpush3.bf16.msra.mxu0 %v1748_v8 }
  0x24   : > { %1523 = vmatprep.subr.bf16.mxu0 %v1801_v1 }
  0x25   : > { %1578 = vmatpush3.bf16.msra.mxu1 %v1772_v52  ;;  %v1194_v52 = vld [vmem:[%s2249_s9 + $0x10] sm:$0xff] }
  0x26   : > { %1520 = vmatmul.mubr.bf16.vlgmr.msra.gmra.mrb[0].mxu0 %v421_v13  ;;  %1583 = vmatprep.subr.bf16.mxu1 %v1801_v1  ;;  %v1705_v55 = vpack.c.bf16 %v1195_v54, %v1194_v52 }
  0x27   : > { %1524 = vmatpush3.bf16.msra.mxu0 %v1749_v14  ;;  %1539 = vmatprep.mubr.msk.bf16.mxu0 %vm1802_vm0, %v1801_v1 }
  0x28   : > { %1525 = vmatprep.subr.bf16.mxu0 %v1801_v1 }
  0x2b   : > { %1526 = vmatpush3.bf16.msra.mxu0 %v1750_v15 }
  0x2c   : > { %1527 = vmatprep.subr.bf16.mxu0 %v1801_v1 }
  0x2f   : > { %1528 = vmatpush3.bf16.msra.mxu0 %v1751_v18 }
  0x30   : > { %1529 = vmatprep.subr.bf16.mxu0 %v1801_v1 }
  0x33   : > { %1530 = vmatpush3.bf16.msra.mxu0 %v1752_v20 }
  0x34   : > { %1531 = vmatprep.subr.bf16.mxu0 %v1801_v1 }
  0x37   : > { %1532 = vmatpush3.bf16.msra.mxu0 %v1753_v22 }
  0x38   : > { %1533 = vmatprep.subr.bf16.mxu0 %v1801_v1 }
  0x3b   : > { %1534 = vmatpush3.bf16.msra.mxu0 %v1754_v25  ;;  %v1776_v25 = vld [vmem:[%s2244_s4 + $0x18] sm:$0xff]  }
  0x3c   : > { %1535 = vmatprep.subr.bf16.mxu0 %v1801_v1 }
  0x3f   : > { %1536 = vmatpush3.bf16.msra.mxu0 %v1755_v29  ;;  %v1779_v29 = vld [vmem:[%s2244_s4 + $0x30] sm:$0xff]  }
  0x40   : > { %1537 = vmatprep.subr.bf16.mxu0 %v1801_v1 }
  0x43   : > { %1538 = vmatpush3.bf16.msra.mxu0 %v1756_v31  ;;  %v1781_v31 = vld [vmem:[%s2246_s6] sm:$0xff]  }
  0x44   : > { %1543 = vmatprep.subr.bf16.mxu0 %v1801_v1 }
  0x46   : > { %1540 = vmatmul.mubr.msk.bf16.vlgmr.msra.gmra.mrb[0].mxu0 %vm1997_vm4, %v1374_v34  ;;  %v1784_v34 = vld [vmem:[%s2246_s6 + $0x18] sm:$0xff]  }
  0x47   : > { %1544 = vmatpush3.bf16.msra.mxu0 %v1757_v36  ;;  %1559 = vmatprep.mubr.msk.bf16.mxu0 %vm1802_vm0, %v1801_v1  ;;  %v1786_v36 = vld [vmem:[%s2246_s6 + $0x28] sm:$0xff]  }
  0x48   : > { %1545 = vmatprep.subr.bf16.mxu0 %v1801_v1 }
  0x4b   : > { %1546 = vmatpush3.bf16.msra.mxu0 %v1758_v37  ;;  %v1787_v37 = vld [vmem:[%s2246_s6 + $0x30] sm:$0xff]  }
  0x4c   : > { %1547 = vmatprep.subr.bf16.mxu0 %v1801_v1 }
  0x4f   : > { %1548 = vmatpush3.bf16.msra.mxu0 %v1759_v38  ;;  %v1788_v38 = vld [vmem:[%s2246_s6 + $0x38] sm:$0xff]  }
  0x50   : > { %1549 = vmatprep.subr.bf16.mxu0 %v1801_v1 }
  0x53   : > { %1550 = vmatpush3.bf16.msra.mxu0 %v1760_v39  ;;  %v1112_v39 = vld [vmem:[%s2247_s7 + $0x40] sm:$0xff] }
  0x54   : > { %1551 = vmatprep.subr.bf16.mxu0 %v1801_v1 }
  0x57   : > { %1552 = vmatpush3.bf16.msra.mxu0 %v1761_v40  ;;  %v1113_v40 = vld [vmem:[%s2247_s7 + $0x48] sm:$0xff] }
  0x58   : > { %1553 = vmatprep.subr.bf16.mxu0 %v1801_v1 }
  0x5b   : > { %1554 = vmatpush3.bf16.msra.mxu0 %v1762_v41  ;;  %v1690_v41 = vpack.c.bf16 %v1113_v40, %v1112_v39 }
  0x5c   : > { %1555 = vmatprep.subr.bf16.mxu0 %v1801_v1 }
  0x5f   : > { %1556 = vmatpush3.bf16.msra.mxu0 %v1763_v45  ;;  %v1117_v45 = vld [vmem:[%s2247_s7 + $0x68] sm:$0xff] }
  0x60   : > { %1557 = vmatprep.subr.bf16.mxu0 %v1801_v1  ;;  %v1696_v46 = vpack.c.bf16 %v1117_v45, %v1116_v44 }
  0x63   : > { %1558 = vmatpush3.bf16.msra.mxu0 %v1764_v47  ;;  %v1118_v47 = vld [vmem:[%s2247_s7 + $0x70] sm:$0xff] }
  0x64   : > { %1677 = vmatprep.subr.bf16.mxu0 %v1804_v56  ;;  %v1699_v49 = vpack.c.bf16 %v1119_v48, %v1118_v47 }
  0x66   : > { %1560 = vmatmul.mubr.msk.bf16.vlgmr.msra.gmra.mrb[0].mxu0 %vm2046_vm7, %v1385_v50  ;;  %v1192_v50 = vld [vmem:[%s2249_s9] sm:$0xff] }
  0x67   : > { %1655 = vmatprep.mubr.msk.f32.mxu0 %vm1802_vm0, %v1801_v1  ;;  %1679 = vmatpush3.bf16.msra.mxu0 %v1678_v57  ;;  %v1702_v53 = vpack.c.bf16 %v1193_v51, %v1192_v50  ;;  %v1196_v57 = vld [vmem:[%s2249_s9 + $0x20] sm:$0xff] }
  0x68   : > { %1680 = vmatprep.subr.bf16.mxu0 %v1804_v56 }
  0x6b   : > { %1682 = vmatpush3.bf16.msra.mxu0 %v1681_v59  ;;  %v1708_v59 = vpack.c.bf16 %v1197_v58, %v1196_v57 }
  0x6c   : > { %1683 = vmatprep.subr.bf16.mxu0 %v1804_v56 }
  0x6f   : > { %1685 = vmatpush3.bf16.msra.mxu0 %v1684_v62 }
  0x70   : > { %1686 = vmatprep.subr.bf16.mxu0 %v1804_v56 }
  0x73   : > { %1688 = vmatpush3.bf16.msra.mxu0 %v1687_v2 }
  0x74   : > { %1689 = vmatprep.subr.bf16.mxu0 %v1804_v56 }
  0x77   : > { %1691 = vmatpush3.bf16.msra.mxu0 %v1690_v41 }
  0x78   : > { %1692 = vmatprep.subr.bf16.mxu0 %v1804_v56 }
 0x139   : > { %v754_v3 = vpop.f32.mrb[0].mxu0 }
 0x13a   : > { %v763_v4 = vmax.f32 %v754_v3, 0.0  ;;  %v1561_v5 = vpop.f32.mrb[1].mxu0 }
 0x13b   : > { %v757_v6 = vpop.f32.mrb[2].mxu0 }
 0x13c   : > { %v764_v7 = vmax.f32 %v757_v6, 0.0  ;;  %v1562_v8 = vpop.f32.mrb[3].mxu0  ;;  %v766_v11 = vrot.slane %v763_v4, 7  ;;  %v773_v13 = vrot.slane %v763_v4, 1 }
 0x13d   : > { %v1198_v8 = vld [vmem:[%s2249_s9 + $0x30] sm:$0xff] }
 0x13e   : > { %v767_v14 = vrot.slane %v764_v7, 7  ;;  %v774_v15 = vrot.slane %v764_v7, 1  ;;  %v765_v16 = vpack.c.bf16 %v764_v7, %v763_v4 }
 0x140   : > { %v768_v17 = vsel %vm424_vm1, %v766_v11, %v767_v14  ;;  %v769_v18 = vsel %vm424_vm1, %v767_v14, %v766_v11  ;;  %v775_v19 = vsel %vm436_vm5, %v773_v13, %v774_v15  ;;  %v776_v20 = vsel %vm436_vm5, %v774_v15, %v773_v13  ;;  %1580 = vmatmul.mubr.bf16.vlgmr.msra.gmra.mrb[0].mxu1 %v765_v16 }
 0x141   : > { %v1404_v21 = vpack.c.bf16 %v768_v17, %v769_v18  ;;  %v1415_v22 = vpack.c.bf16 %v776_v20, %v775_v19  ;;  %1584 = vmatpush3.bf16.msra.mxu1 %v1773_v12  ;;  %1599 = vmatprep.mubr.msk.bf16.mxu1 %vm1802_vm0, %v1801_v1  ;;  %v1120_v12 = vld [vmem:[%s2248_s8] sm:$0x1] }
 0x142   : > { %1585 = vmatprep.subr.bf16.mxu1 %v1801_v1  ;;  %v1200_v17 = vld [vmem:[%s2250_s10] sm:$0x1] }
 0x145   : > { %1586 = vmatpush3.bf16.msra.mxu1 %v1774_v23 }
 0x146   : > { %1587 = vmatprep.subr.bf16.mxu1 %v1801_v1 }
 0x149   : > { %1588 = vmatpush3.bf16.msra.mxu1 %v1775_v24  ;;  %v1283_v24 = vsub.s32 0, %v1977_v26 }
 0x14a   : > { %1589 = vmatprep.subr.bf16.mxu1 %v1801_v1 }
 0x14d   : > { %1590 = vmatpush3.bf16.msra.mxu1 %v1776_v25 }
 0x14e   : > { %1591 = vmatprep.subr.bf16.mxu1 %v1801_v1 }
 0x151   : > { %1592 = vmatpush3.bf16.msra.mxu1 %v1777_v27 }
 0x152   : > { %1593 = vmatprep.subr.bf16.mxu1 %v1801_v1 }
 0x155   : > { %1594 = vmatpush3.bf16.msra.mxu1 %v1778_v28 }
 0x156   : > { %1595 = vmatprep.subr.bf16.mxu1 %v1801_v1 }
 0x159   : > { %1596 = vmatpush3.bf16.msra.mxu1 %v1779_v29 }
 0x15a   : > { %1597 = vmatprep.subr.bf16.mxu1 %v1801_v1 }
 0x15d   : > { %1598 = vmatpush3.bf16.msra.mxu1 %v1780_v30 }
 0x15e   : > { %1603 = vmatprep.subr.bf16.mxu1 %v1801_v1 }
 0x160   : > { %1600 = vmatmul.mubr.msk.bf16.vlgmr.msra.gmra.mrb[0].mxu1 %vm1997_vm4, %v1404_v21 }
 0x161   : > { %1604 = vmatpush3.bf16.msra.mxu1 %v1781_v31  ;;  %1619 = vmatprep.mubr.msk.bf16.mxu1 %vm1802_vm0, %v1801_v1 }
 0x162   : > { %1605 = vmatprep.subr.bf16.mxu1 %v1801_v1 }
 0x165   : > { %1606 = vmatpush3.bf16.msra.mxu1 %v1782_v32 }
 0x166   : > { %1607 = vmatprep.subr.bf16.mxu1 %v1801_v1 }
 0x169   : > { %1608 = vmatpush3.bf16.msra.mxu1 %v1783_v33 }
 0x16a   : > { %1609 = vmatprep.subr.bf16.mxu1 %v1801_v1 }
 0x16d   : > { %1610 = vmatpush3.bf16.msra.mxu1 %v1784_v34 }
 0x16e   : > { %1611 = vmatprep.subr.bf16.mxu1 %v1801_v1 }
 0x171   : > { %1612 = vmatpush3.bf16.msra.mxu1 %v1785_v35 }
 0x172   : > { %1613 = vmatprep.subr.bf16.mxu1 %v1801_v1 }
 0x175   : > { %1614 = vmatpush3.bf16.msra.mxu1 %v1786_v36 }
 0x176   : > { %1615 = vmatprep.subr.bf16.mxu1 %v1801_v1 }
 0x179   : > { %1616 = vmatpush3.bf16.msra.mxu1 %v1787_v37 }
 0x17a   : > { %1617 = vmatprep.subr.bf16.mxu1 %v1801_v1 }
 0x17d   : > { %1618 = vmatpush3.bf16.msra.mxu1 %v1788_v38 }
 0x17e   : > { %1701 = vmatprep.subr.bf16.mxu1 %v1804_v56 }
 0x180   : > { %1620 = vmatmul.mubr.msk.bf16.vlgmr.msra.gmra.mrb[0].mxu1 %vm2046_vm7, %v1415_v22 }
 0x181   : > { %1674 = vmatprep.mubr.msk.f32.mxu1 %vm1802_vm0, %v1801_v1  ;;  %v1115_v1 = vld [vmem:[%s2247_s7 + $0x58] sm:$0xff]  ;;  %1703 = vmatpush3.bf16.msra.mxu1 %v1702_v53 }
 0x182   : > { %v1693_v43 = vpack.c.bf16 %v1115_v1, %v1114_v42  ;;  %1704 = vmatprep.subr.bf16.mxu1 %v1804_v56 }
 0x184   : > { %1694 = vmatpush3.bf16.msra.mxu0 %v1693_v43 }
 0x185   : > { %1695 = vmatprep.subr.bf16.mxu0 %v1804_v56  ;;  %1706 = vmatpush3.bf16.msra.mxu1 %v1705_v55 }
 0x186   : > { %1707 = vmatprep.subr.bf16.mxu1 %v1804_v56 }
 0x188   : > { %1697 = vmatpush3.bf16.msra.mxu0 %v1696_v46 }
 0x189   : > { %1698 = vmatprep.subr.bf16.mxu0 %v1804_v56  ;;  %1709 = vmatpush3.bf16.msra.mxu1 %v1708_v59 }
 0x18a   : > { %1710 = vmatprep.subr.bf16.mxu1 %v1804_v56  ;;  %v1199_v56 = vld [vmem:[%s2249_s9 + $0x38] sm:$0xff] }
 0x18b   : > { %v1711_v11 = vpack.c.bf16 %v1199_v56, %v1198_v8 }
 0x18c   : > { %1700 = vmatpush3.bf16.msra.mxu0 %v1699_v49 }
 0x18d   : > { %1712 = vmatpush3.bf16.msra.mxu1 %v1711_v11 }
 0x253   : > { %v1088_v60 = vpop.f32.mrb[0].mxu1 }
 0x254   : > { %v1621_v61 = vpop.f32.mrb[1].mxu1 }
 0x255   : > { %v1091_v62 = vpop.f32.mrb[2].mxu1 }
 0x256   : > { %v1097_v63 = vadd.f32 %v1091_v62, %v1088_v60  ;;  %v1622_v0 = vpop.f32.mrb[3].mxu1 }
 0x258   : > { %v1098_v2 = vrot.slane %v1097_v63, 4 }
 0x25a   : > { %v1099_v3 = vadd.f32 %v1098_v2, %v1097_v63 }
 0x25c   : > { %v1100_v4 = vrot.slane %v1099_v3, 2 }
 0x25e   : > { %v1101_v5 = vadd.f32 %v1100_v4, %v1099_v3 }
 0x260   : > { %v1102_v6 = vrot.slane %v1101_v5, 1 }
 0x262   : > { %v1103_v7 = vadd.f32 %v1102_v6, %v1101_v5 }
 0x264   : > { %1656 = vmatmul.mubr.f32.vlgmr.msra.gmra.mrb[4].mxu0 %v1103_v7 }
 0x337   : > { %v1187_v13 = vpop.f32.mrb[4].mxu0 }
 0x338   : > { %v1188_v14 = vadd.f32 %v1187_v13, %v1120_v12  ;;  %v1657_v15 = vpop.f32.mrb[5].mxu0 }
 0x33a   : > { %v1191_v16 = vmax.f32 %v1188_v14, 0.0 }
 0x33c   : > { %1675 = vmatmul.mubr.msk.f32.vlgmr.msra.gmra.mrb[4].mxu1 %vm1201_vm8, %v1191_v16 }
 0x40f   : > { %v1271_v18 = vpop.f32.mrb[4].mxu1 }
 0x410   : > { %v1272_v19 = vadd.f32 %v1271_v18, %v1200_v17  ;;  %v1676_v20 = vpop.f32.mrb[5].mxu1 }
 0x412   : > { %v1418_v21 = vmul.f32 -1.442695, %v1272_v19 }
 0x414   : > { %1789 = vpow2.f32 %v1418_v21 }
 0x41e   : > { %v1790_v22 = vpop.eup %1789 }
 0x41f   : > { %v1278_v23 = vadd.f32 1.0, %v1790_v22 }
 0x421   : > { %1791 = vrcp.f32 %v1278_v23 }
 0x42b   : > { %v1792_v25 = vpop.eup %1791 }
 0x42c   : > { %v1284_v27 = vrot.slane %v1792_v25, %v1283_v24 }
 0x42e   : > { %v1285_v28 = vmul.f32 %v1284_v27, %v1088_v60  ;;  %v1286_v29 = vmul.f32 %v1284_v27, %v1091_v62 }
 0x430   : > { %v1287_v30 = vadd.f32 %v1285_v28, %v1917_v9  ;;  %v1288_v31 = vadd.f32 %v1286_v29, %v1919_v10 }
 0x432   : > { %v1289_v32 = vmax.f32 %v1287_v30, 0.0  ;;  %v1290_v33 = vmax.f32 %v1288_v31, 0.0 }
 0x434   : > { %1291 = vst [vmem:[%s386_s28] sm:$0xff] %v1289_v32  ;;  %1292 = vst [vmem:[%s386_s28 + $0x8] sm:$0xff] %v1290_v33 }
 0x435 PF: > { %s21_s17 = sadd.s32 1, %s1799_s17  }
 0x436   : > { %p18_p4 = scmp.ge.s32.totalorder %s21_s17, 4  }
 0x438   :  { %20 = sbr.rel (!%p18_p4) target bundleno = 1 (0x1), region = 94 }

</bundles_post_ra>
